<compile_context>
chip_gen: v7x
topology: tpu7x:2x2x1
jax: 0.10.0
libtpu: 0.0.40
codegen_flags: <defaults>
</compile_context>

<pallas_src>
import functools

import jax
import jax.numpy as jnp
import numpy as np
from jax.experimental import pallas as pl
from jax.experimental.pallas import tpu as pltpu

_TM = 1024           # token tile on the lane axis (multiple of 128)
_MASK_BASE = 0.3333
_MASK_SCALE = 0.6667


def _round_up(x, m):
    return (x + m - 1) // m * m


def _padded_len(tokens):
    """(padded token count, tile size) for the lane-dense layout."""
    padded = max(_round_up(tokens, 128), 128)
    tm = min(_TM, padded)
    padded = _round_up(padded, tm)
    return padded, tm


def _routing_kernel(*refs, jitter_eps, training):
    """SparseMixerV2 top-1 routing for one (E, TM) tile.

    refs (training): logits_ref, gumbel_ref, rand_ref, mult_ref, sample_ref
    refs (eval)    : logits_ref, mult_ref, sample_ref
    """
    if training:
        logits_ref, gumbel_ref, rand_ref, mult_ref, sample_ref = refs
    else:
        logits_ref, mult_ref, sample_ref = refs

    scores = logits_ref[...].astype(jnp.float32)                  # (E, TM)
    num_experts = scores.shape[0]
    expert_iota = jax.lax.broadcasted_iota(jnp.int32, scores.shape, 0)
    neg_inf = jnp.float32(-jnp.inf)

    # ---- jitter threshold mask (torch.no_grad block) -----------------------
    max_val = jnp.max(scores, axis=0, keepdims=True)              # (1, TM)
    max_ind = jnp.min(jnp.where(scores == max_val, expert_iota, num_experts),
                      axis=0, keepdims=True)                      # first argmax
    factor = jnp.maximum(jnp.abs(scores), max_val)                # abs().clamp(min=max)
    thresh = (max_val - scores) / factor > 2.0 * jitter_eps
    masked_logits = jnp.where(thresh, neg_inf, scores)            # masked_fill(-inf)

    # softmax over the masked logits.  The row max is never masked, so the
    # softmax max equals max_val and argmax(masked_gates) == max_ind (this
    # removes the redundant gates_max / gates_argmax reductions).
    mexp = jnp.exp(masked_logits - max_val)                       # (E, TM)
    denom = jnp.sum(mexp, axis=0, keepdims=True)                  # (1, TM)
    inv_denom = 1.0 / denom

    if training:
        # (masked_gates - Exp(1).log()).argmax() == argmax(masked + Gumbel)
        noisy = masked_logits + gumbel_ref[...].astype(jnp.float32)
        noisy_max = jnp.max(noisy, axis=0, keepdims=True)
        sel = jnp.min(jnp.where(noisy == noisy_max, expert_iota, num_experts),
                      axis=0, keepdims=True)                      # (1, TM)

        # mask_for_one = 0.3333 + 0.6667 * ((sel == argmax) | (rand > 0.75))
        rand_tok = rand_ref[...].astype(jnp.float32)              # (1, TM)
        keep = jnp.logical_or(sel == max_ind, rand_tok > 0.75)
        mask_for_one = _MASK_BASE + _MASK_SCALE * keep.astype(jnp.float32)

        # gather(masked_gates, dim=0, index=sel) via one-hot sublane reduce
        gathered = jnp.sum(jnp.where(expert_iota == sel, mexp, 0.0),
                           axis=0, keepdims=True)
        multiplier = gathered * inv_denom * mask_for_one
    else:
        # eval: sel == max_ind == argmax(masked_gates)
        #   => gather == exp(0)/denom == 1/denom, mask_for_one is constant.
        sel = max_ind
        multiplier = (_MASK_BASE + _MASK_SCALE) * inv_denom

    mult_ref[...] = multiplier.astype(mult_ref.dtype)             # (1, TM)
    sample_ref[...] = sel.astype(jnp.int32)                       # (1, TM)


class SparseMixerV2Pallas:
    """Pallas port of SparseMixerV2 forward (top_k = 1)."""

    def __init__(self, num_experts, embed_dim, compute_balance_loss=False,
                 jitter_eps=0.1):
        self.num_experts = num_experts
        self.embed_dim = embed_dim            # unused by forward (as in torch)
        self.compute_balance_loss = compute_balance_loss
        self.jitter_eps = jitter_eps
        self.training = False

    def __call__(self, logits, key=None):
        tokens, num_experts = logits.shape
        assert num_experts == self.num_experts
        padded, tm = _padded_len(tokens)
        grid = (padded // tm,)

        # transposed, lane-dense layout: experts -> sublanes, tokens -> lanes
        scores_t = jnp.pad(logits.T, ((0, 0), (0, padded - tokens)))

        in_specs = [pl.BlockSpec((num_experts, tm), lambda i: (0, i))]
        inputs = [scores_t]
        if self.training:
            if key is None:
                key = jax.random.PRNGKey(0)
            kg, kr = jax.random.split(key)
            # -log(Exp(1)) is a standard Gumbel(0, 1) draw.
            gumbel = jax.random.gumbel(kg, (num_experts, padded), jnp.float32)
            rand_tok = jax.random.uniform(kr, (1, padded), jnp.float32)
            in_specs += [pl.BlockSpec((num_experts, tm), lambda i: (0, i)),
                         pl.BlockSpec((1, tm), lambda i: (0, i))]
            inputs += [gumbel, rand_tok]

        itemsize = jnp.dtype(logits.dtype).itemsize
        bytes_in = padded * num_experts * itemsize
        if self.training:
            bytes_in += padded * num_experts * 4 + padded * 4
        cost = pl.CostEstimate(flops=20 * padded * num_experts,
                               transcendentals=padded * num_experts,
                               bytes_accessed=bytes_in + padded * (itemsize + 4))

        kernel = functools.partial(_routing_kernel,
                                   jitter_eps=self.jitter_eps,
                                   training=self.training)
        mult_t, sample_t = pl.pallas_call(
            kernel,
            out_shape=(jax.ShapeDtypeStruct((1, padded), logits.dtype),
                       jax.ShapeDtypeStruct((1, padded), jnp.int32)),
            grid=grid,
            in_specs=in_specs,
            out_specs=(pl.BlockSpec((1, tm), lambda i: (0, i)),
                       pl.BlockSpec((1, tm), lambda i: (0, i))),
            compiler_params=pltpu.CompilerParams(
                dimension_semantics=("parallel",)),
            cost_estimate=cost,
        )(*inputs)

        # back to the torch convention: (tokens, 1) keepdim outputs
        sample = sample_t[0, :tokens].reshape(tokens, 1)
        mult = mult_t[0, :tokens].reshape(tokens, 1)

        balance_loss = 0.0
        # TODO(synk): compute_balance_loss branch in the reference uses an
        # undefined name `p`; not implemented (default path returns 0.0).
        return sample, mult, balance_loss


def _reference(logits, jitter_eps, gumbel=None, rand=None):
    """Pure numpy reference (eval if gumbel/rand are None, else training)."""
    scores = np.asarray(logits, np.float32)
    num_experts = scores.shape[-1]
    max_val = scores.max(-1, keepdims=True)
    max_ind = scores.argmax(-1).reshape(-1, 1)
    factor = np.maximum(np.abs(scores), max_val)
    with np.errstate(divide="ignore", invalid="ignore"):
        mask = (max_val - scores) / factor > 2.0 * jitter_eps
    masked = np.where(mask, np.float32(-np.inf), scores).astype(np.float32)
    if gumbel is not None:
        sel = np.argmax(masked + gumbel.astype(np.float32), -1).reshape(-1, 1)
    else:
        sel = max_ind
    e = np.exp(masked - max_val)
    gates = e / e.sum(-1, keepdims=True)
    gates_argmax = np.argmax(gates, -1).reshape(-1, 1)
    if rand is not None:
        keep = np.logical_or(sel == gates_argmax, rand > 0.75)
    else:
        keep = np.ones_like(sel, dtype=bool)
    mfo = np.float32(_MASK_BASE) + np.float32(_MASK_SCALE) * keep.astype(np.float32)
    mult = np.take_along_axis(gates, sel, -1) * mfo
    return sel.astype(np.int32), mult.astype(np.float32)


if __name__ == "__main__":
    key = jax.random.PRNGKey(0)
    batch, seq, num_experts, embed_dim = 2, 8, 8, 32
    tokens = batch * seq
    logits = jax.random.normal(key, (tokens, num_experts), dtype=jnp.float32)

    mixer = SparseMixerV2Pallas(num_experts, embed_dim, jitter_eps=0.1)

    # ---- eval mode: deterministic routing ----------------------------------
    mixer.training = False
    sample, mult, loss = mixer(logits)
    jax.block_until_ready((sample, mult))
    ref_sample, ref_mult = _reference(logits, mixer.jitter_eps)
    assert sample.shape == (tokens, 1) and mult.shape == (tokens, 1)
    assert np.array_equal(np.asarray(sample), ref_sample), "eval sample mismatch"
    assert np.allclose(np.asarray(mult), ref_mult, atol=1e-5), "eval multiplier mismatch"
    assert loss == 0.0

    # ---- training mode: Gumbel-max expert sampling --------------------------
    mixer.training = True
    train_key = jax.random.PRNGKey(123)
    sample_t, mult_t, _ = mixer(logits, key=train_key)
    jax.block_until_ready((sample_t, mult_t))

    padded, _ = _padded_len(tokens)
    kg, kr = jax.random.split(train_key)
    gumbel_ref = np.asarray(
        jax.random.gumbel(kg, (num_experts, padded), jnp.float32))[:, :tokens].T
    rand_ref = np.asarray(
        jax.random.uniform(kr, (1, padded), jnp.float32))[0, :tokens].reshape(-1, 1)
    ref_sample_t, ref_mult_t = _reference(logits, mixer.jitter_eps,
                                          gumbel=gumbel_ref, rand=rand_ref)
    assert np.array_equal(np.asarray(sample_t), ref_sample_t), "train sample mismatch"
    assert np.allclose(np.asarray(mult_t), ref_mult_t, atol=1e-5), "train multiplier mismatch"
    assert int(np.asarray(sample_t).min()) >= 0
    assert int(np.asarray(sample_t).max()) < num_experts

    print("KERNEL_OK")
</pallas_src>

<mosaic_0001>
module attributes {stable_mosaic.version = 11 : i64} {
  func.func @_routing_kernel(%arg0: i32, %arg1: memref<8x128xf32, #tpu.memory_space<vmem>>, %arg2: memref<1x128xf32, #tpu.memory_space<vmem>>, %arg3: memref<1x128xi32, #tpu.memory_space<vmem>>) attributes {dimension_semantics = [#tpu.dimension_semantics<parallel>], iteration_bounds = array<i64: 1>, scalar_prefetch = 0 : i64, scratch_operands = 0 : i64, tpu.core_type = #tpu.core_type<tc>, window_params = [{transform_indices = @transform_0, window_bounds = array<i64: 8, 128>}, {transform_indices = @transform_1, window_bounds = array<i64: 1, 128>}, {transform_indices = @transform_2, window_bounds = array<i64: 1, 128>}]} {
    %c0 = arith.constant 0 : index
    %c0_0 = arith.constant 0 : index
    %0 = vector.load %arg1[%c0, %c0_0] : memref<8x128xf32, #tpu.memory_space<vmem>>, vector<8x128xf32>
    %1 = tpu.iota {dimensions = array<i32: 0>} : vector<8x128xi32>
    %cst = arith.constant dense<0xFF800000> : vector<128xf32>
    %2 = vector.multi_reduction <maximumf>, %0, %cst [0] : vector<8x128xf32> to vector<128xf32>
    %3 = vector.shape_cast %2 : vector<128xf32> to vector<1x128xf32>
    %4 = vector.broadcast %3 : vector<1x128xf32> to vector<8x128xf32>
    %5 = arith.cmpf oeq, %0, %4 : vector<8x128xf32>
    %c8_i32 = arith.constant 8 : i32
    %6 = vector.broadcast %c8_i32 : i32 to vector<8x128xi32>
    %7 = arith.select %5, %1, %6 : vector<8x128xi1>, vector<8x128xi32>
    %cst_1 = arith.constant dense<2147483647> : vector<128xi32>
    %8 = vector.multi_reduction <minsi>, %7, %cst_1 [0] : vector<8x128xi32> to vector<128xi32>
    %9 = vector.shape_cast %8 : vector<128xi32> to vector<1x128xi32>
    %10 = math.absf %0 : vector<8x128xf32>
    %11 = vector.broadcast %3 : vector<1x128xf32> to vector<8x128xf32>
    %12 = arith.maximumf %10, %11 : vector<8x128xf32>
    %13 = vector.broadcast %3 : vector<1x128xf32> to vector<8x128xf32>
    %14 = arith.subf %13, %0 : vector<8x128xf32>
    %15 = arith.divf %14, %12 : vector<8x128xf32>
    %cst_2 = arith.constant 2.000000e-01 : f32
    %16 = vector.broadcast %cst_2 : f32 to vector<8x128xf32>
    %17 = arith.cmpf ogt, %15, %16 : vector<8x128xf32>
    %cst_3 = arith.constant 0xFF800000 : f32
    %18 = vector.broadcast %cst_3 : f32 to vector<8x128xf32>
    %19 = arith.select %17, %18, %0 : vector<8x128xi1>, vector<8x128xf32>
    %20 = vector.broadcast %3 : vector<1x128xf32> to vector<8x128xf32>
    %21 = arith.subf %19, %20 : vector<8x128xf32>
    %22 = math.exp %21 : vector<8x128xf32>
    %cst_4 = arith.constant dense<0.000000e+00> : vector<128xf32>
    %23 = vector.multi_reduction <add>, %22, %cst_4 [0] : vector<8x128xf32> to vector<128xf32>
    %24 = vector.shape_cast %23 : vector<128xf32> to vector<1x128xf32>
    %cst_5 = arith.constant 1.000000e+00 : f32
    %25 = vector.broadcast %cst_5 : f32 to vector<1x128xf32>
    %26 = arith.divf %25, %24 : vector<1x128xf32>
    %cst_6 = arith.constant 1.000000e+00 : f32
    %27 = vector.broadcast %cst_6 : f32 to vector<1x128xf32>
    %28 = arith.mulf %27, %26 : vector<1x128xf32>
    %c0_7 = arith.constant 0 : index
    %c0_8 = arith.constant 0 : index
    %29 = vector.load %arg2[%c0_7, %c0_8] : memref<1x128xf32, #tpu.memory_space<vmem>>, vector<1x128xf32>
    tpu.vector_store %arg2[%c0_7, %c0_8], %28 {strides = array<i32>} : memref<1x128xf32, #tpu.memory_space<vmem>>, vector<1x128xf32>,
    %c0_9 = arith.constant 0 : index
    %c0_10 = arith.constant 0 : index
    %30 = vector.load %arg3[%c0_9, %c0_10] : memref<1x128xi32, #tpu.memory_space<vmem>>, vector<1x128xi32>
    tpu.vector_store %arg3[%c0_9, %c0_10], %9 {strides = array<i32>} : memref<1x128xi32, #tpu.memory_space<vmem>>, vector<1x128xi32>,
    return
  }
  func.func @transform_0(%arg0: i32) -> (i32, i32) {
    %c0_i32 = arith.constant 0 : i32
    %c0_i32_0 = arith.constant 0 : i32
    return %c0_i32, %arg0 : i32, i32
  }
  func.func @transform_1(%arg0: i32) -> (i32, i32) {
    %c0_i32 = arith.constant 0 : i32
    %c0_i32_0 = arith.constant 0 : i32
    return %c0_i32, %arg0 : i32, i32
  }
  func.func @transform_2(%arg0: i32) -> (i32, i32) {
    %c0_i32 = arith.constant 0 : i32
    %c0_i32_0 = arith.constant 0 : i32
    return %c0_i32, %arg0 : i32, i32
  }
}

</mosaic_0001>

<bundles_post_ra>
// kernel: tpu_custom_call.1
= control target key start
LH: loop header
LB: loop body
LE: loop exit
PB: predicated region body
PF: predicated region fallthrough
CT: control target
= control target key end

     0   :  { %8 = vsyncpa [#allocation3], 0  ;;  %s228_s0 = inlined_call_operand.hbm [shape: f32[8,128], index: 0, kind: input, shape index: {}]   ;;  %s229_s1 = inlined_call_operand.hbm [shape: f32[1,128], index: 1, kind: output, shape index: {0}]   ;;  %s230_s2 = inlined_call_operand.hbm [shape: s32[1,128], index: 2, kind: output, shape index: {1}]  }
   0x1   :  { %9 = vsyncpa [#allocation4], 0 }
   0x2   :  { %10 = vsyncpa [#allocation7], 0  ;;  %s174_s9 = smov [#allocation2]   ;;  %s102_s13 = scalar_lea.hbm %s228_s0, 128 }
   0x3   :  { %s17_s10 = sshll.u32 %s174_s9, 4  ;;  %p103_p0 = scmp.ne.s32.totalorder %s228_s0, %s102_s13  ;;  %s18_s10 = int_to_ptr.vmem [resolvable:$true] %s17_s10 }
   0x4   :  { %p106_p1 = scmp.lt.u32.totalorder %s102_s13, %s228_s0 }
   0x6   :  { %p108_p2 = pnand %p106_p1, %p103_p0 }
   0x8   :  { %111 = shalt.err (!%p108_p2)
}
   0x9   :  { %s112_s18 = scalar_lea.vmem %s18_s10, 128  ;;  %p117_p4 = scmp.lt.s32.totalorder %s18_s10, %s18_s10 }
   0xa   :  { %p113_p3 = scmp.ne.s32.totalorder %s18_s10, %s112_s18  ;;  %p118_p5 = scmp.lt.s32.totalorder %s112_s18, %s112_s18 }
   0xc   :  { %p119_p6 = por %p118_p5, %p117_p4 }
   0xe   :  { %p120_p7 = pnand %p119_p6, %p113_p3 }
  0x10   :  { %123 = shalt.err (!%p120_p7)
}
  0x11   :  { %20 = dma.hbm_to_vmem [thread:$0]  %s228_s0, 128, %s18_s10, [#allocation3]  }
  0x12   :  { %168 = dma.done.wait [#allocation3], 128  }
  0x13   :  { %169 = vsyncadd [#allocation3], 4294967168  ;;  %v24_v0 = vld [vmem:[#allocation2] sm:$0xff]  ;;  %v25_v4 = vlaneseq  ;;  %s175_s0 = smov [#allocation6]  }
  0x14   :  { %v27_v1 = vrot.slane %v24_v0, 4  ;;  %v44_v7 = vand.u32 2147483647, %v24_v0  ;;  %s80_s21 = sshll.u32 %s175_s0, 4  ;;  %s81_s21 = int_to_ptr.vmem [resolvable:$true] %s80_s21 }
  0x15   :  { %v26_v8 = vshrl.u32 %v25_v4, 7  ;;  %s124_s22 = scalar_lea.vmem %s81_s21, 16  ;;  %s128_s23 = scalar_lea.vmem %s81_s21, 32 }
  0x16   :  { %v28_v2 = vmax.f32 %v24_v0, %v27_v1  ;;  %p125_p8 = scmp.ne.s32.totalorder %s81_s21, %s124_s22  ;;  %p129_p9 = scmp.lt.s32.totalorder %s81_s21, %s81_s21 }
  0x17   :  { %p130_p10 = scmp.lt.s32.totalorder %s128_s23, %s124_s22 }
  0x18   :  { %v29_v3 = vrot.slane %v28_v2, 2 }
  0x19   :  { %p131_p11 = por %p130_p10, %p129_p9 }
  0x1a   :  { %v30_v5 = vmax.f32 %v28_v2, %v29_v3 }
  0x1b   :  { %p132_p12 = pnand %p131_p11, %p125_p8 }
  0x1c   :  { %v31_v6 = vrot.slane %v30_v5, 1 }
  0x1e   :  { %v32_v9 = vmax.f32 %v30_v5, %v31_v6 }
  0x20   :  { %v45_v10 = vmax.f32 %v44_v7, %v32_v9  ;;  %vm33_vm0 = vcmp.eq.f32.partialorder %v24_v0, %v32_v9  ;;  %v46_v15 = vsub.f32 %v32_v9, %v24_v0 }
  0x21   :  { %v34_v11 = vsel %vm33_vm0, %v26_v8, 8 }
  0x22   :  { %96 = vrcp.f32 %v45_v10  ;;  %v35_v12 = vrot.slane %v34_v11, 4 }
  0x24   :  { %vm36_vm1 = vcmp.lt.s32.totalorder %v34_v11, %v35_v12 }
  0x25   :  { %v37_v13 = vsel %vm36_vm1, %v34_v11, %v35_v12 }
  0x26   :  { %v38_v14 = vrot.slane %v37_v13, 2 }
  0x28   :  { %vm39_vm2 = vcmp.lt.s32.totalorder %v37_v13, %v38_v14 }
  0x29   :  { %v40_v16 = vsel %vm39_vm2, %v37_v13, %v38_v14 }
  0x2a   :  { %v41_v17 = vrot.slane %v40_v16, 1 }
  0x2c   :  { %v97_v18 = vpop.eup %96  ;;  %vm42_vm3 = vcmp.lt.s32.totalorder %v40_v16, %v41_v17 }
  0x2d   :  { %v48_v19 = vmul.f32 %v97_v18, %v46_v15  ;;  %v43_v20 = vsel %vm42_vm3, %v40_v16, %v41_v17 }
  0x2e   :  { %63 = vst [vmem:[#allocation6] sm:$0x1] %v43_v20 }
  0x2f   :  { %vm49_vm4 = vcmp.gt.f32.partialorder %v48_v19, 0.2 }
  0x30   :  { %135 = shalt.err (!%p132_p12)
}
  0x31   :  { %s136_s26 = scalar_lea.hbm %s230_s2, 16 }
  0x32   :  { %p137_p13 = scmp.ne.s32.totalorder %s230_s2, %s136_s26  ;;  %p140_p0 = scmp.lt.u32.totalorder %s136_s26, %s230_s2 }
  0x34   :  { %p142_p1 = pnand %p140_p0, %p137_p13 }
  0x36   :  { %145 = shalt.err (!%p142_p1)
}
  0x37   :  { %83 = dma.vmem_to_hbm [thread:$0]  %s81_s21, 16, %s230_s2, [#allocation7]   ;;  %v50_v21 = vsel %vm49_vm4, -inf, %v24_v0 }
  0x38   :  { %v51_v22 = vsub.f32 %v50_v21, %v32_v9  ;;  %s176_s5 = smov [#allocation5]  }
  0x39   :  { %s70_s6 = sshll.u32 %s176_s5, 4  ;;  %s71_s6 = int_to_ptr.vmem [resolvable:$true] %s70_s6 }
  0x3a   :  { %v52_v23 = vmul.f32 1.442695, %v51_v22  ;;  %s146_s7 = scalar_lea.vmem %s71_s6, 16  ;;  %s150_s2 = scalar_lea.vmem %s71_s6, 32 }
  0x3b   :  { %p147_p2 = scmp.ne.s32.totalorder %s71_s6, %s146_s7  ;;  %p151_p3 = scmp.lt.s32.totalorder %s71_s6, %s71_s6 }
  0x3c   :  { %98 = vpow2.f32 %v52_v23  ;;  %p152_p4 = scmp.lt.s32.totalorder %s150_s2, %s146_s7 }
  0x3e   :  { %p153_p5 = por %p152_p4, %p151_p3 }
  0x40   :  { %p154_p6 = pnand %p153_p5, %p147_p2 }
  0x46   :  { %v99_v24 = vpop.eup %98 }
  0x47   :  { %v54_v25 = vrot.slane %v99_v24, 4 }
  0x49   :  { %v55_v26 = vadd.f32 %v99_v24, %v54_v25 }
  0x4b   :  { %v56_v27 = vrot.slane %v55_v26, 2 }
  0x4d   :  { %v57_v28 = vadd.f32 %v56_v27, %v55_v26 }
  0x4f   :  { %v58_v29 = vrot.slane %v57_v28, 1 }
  0x51   :  { %v59_v30 = vadd.f32 %v58_v29, %v57_v28 }
  0x53   :  { %100 = vrcp.f32 %v59_v30 }
  0x5d   :  { %v101_v31 = vpop.eup %100 }
  0x5e   :  { %62 = vst [vmem:[#allocation5] sm:$0x1] %v101_v31 }
  0x5f   :  { %157 = shalt.err (!%p154_p6)
}
  0x60   :  { %s158_s10 = scalar_lea.hbm %s229_s1, 16 }
  0x61   :  { %p159_p7 = scmp.ne.s32.totalorder %s229_s1, %s158_s10  ;;  %p162_p8 = scmp.lt.u32.totalorder %s158_s10, %s229_s1 }
  0x63   :  { %p164_p9 = pnand %p162_p8, %p159_p7 }
  0x65   :  { %167 = shalt.err (!%p164_p9)
}
  0x66   :  { %73 = dma.vmem_to_hbm [thread:$0]  %s71_s6, 16, %s229_s1, [#allocation4]  }
  0x67   :  { %170 = dma.done.wait [#allocation4], 16  }
  0x68   :  { %171 = vsyncadd [#allocation4], 4294967280 }
  0x69   :  { %172 = dma.done.wait [#allocation7], 16  }
  0x6a   :  { %173 = vsyncadd [#allocation7], 4294967280 }
  0x6b   :  { %90 = vsyncpa [#allocation3], 1 }
  0x6c   :  { %91 = vsyncpa [#allocation4], 1 }
  0x6d   :  { %92 = vsyncpa [#allocation7], 1 }

</bundles_post_ra>
